<compile_context>
chip_gen: v6e
topology: v6e:2x2x1
jax: 0.10.0
libtpu: 0.0.40
codegen_flags: <defaults>
</compile_context>

<pallas_src>
import jax
import jax.numpy as jnp
from jax.experimental import pallas as pl
from jax.experimental.pallas import tpu as pltpu

DIM = 1            # in_features of the hidden layer (fixed by the PyTorch module)
LANES = 128        # TPU lane width
SUBLANES = 8       # sublane granularity
MAX_BLOCK_ROWS = 4096   # 4096x128 f32 = 2 MiB per in/out block (x2 for dbl-buffer)
ROW_CHUNK = 32          # lane-rows per inner compute chunk (temps ~0.5 MiB each)


def _round_up(x, m):
    return ((x + m - 1) // m) * m


def prepare_params(hidden_w, hidden_b, out_w, width, *, n_lanes=LANES):
    """One-time parameter prep (outside the forward hot path).

    hidden_w: (N, DIM=1)  PyTorch hidden_layer.weight
    hidden_b: (N,)        PyTorch hidden_layer.bias
    out_w   : (1, N)      PyTorch output_layer.weight (no bias)

    Returns a single (3, Np, 128) f32 tile:
      row 0: hidden weights, row 1: hidden bias, row 2: output weights / width,
    each hidden-unit scalar broadcast across the 128 lanes, hidden dim padded
    to a multiple of 8 sublanes with zeros.
    """
    n = hidden_w.shape[0]
    npad = _round_up(max(n, 1), SUBLANES)
    w1 = hidden_w.astype(jnp.float32).reshape(-1)                    # (N,)
    b1 = hidden_b.astype(jnp.float32).reshape(-1)                    # (N,)
    w2s = out_w.astype(jnp.float32).reshape(-1) * (1.0 / float(width))
    stacked = jnp.stack([w1, b1, w2s], axis=0)                       # (3, N)
    stacked = jnp.pad(stacked, ((0, 0), (0, npad - n)))              # (3, Np)
    # Lane-broadcast each scalar across the 128 lanes.
    return jnp.broadcast_to(stacked[:, :, None], (3, npad, n_lanes)).astype(
        jnp.float32
    )


def _make_kernel(block_rows, chunk):
    """Kernel over one (block_rows, 128) lane-major batch block.

    x_ref : (block_rows, 128)  128 batch samples per lane-row
    p_ref : (3, Np, 128)       [w1; b1; w2/width], lane-broadcast, resident
    o_ref : (block_rows, 128)  per-sample result, lane-dense unmasked store
    """
    num_full = block_rows // chunk
    rem = block_rows % chunk

    def kernel(x_ref, p_ref, o_ref):
        p = p_ref[...]            # (3, Np, 128)
        w1 = p[0:1]               # (1, Np, 128) hidden weights
        b1 = p[1:2]               # (1, Np, 128) hidden bias
        w2s = p[2:3]              # (1, Np, 128) output weights pre-scaled by 1/width

        def rows_out(x_rows):                         # (r, 128) -> (r, 128)
            xs = x_rows[:, None, :]                   # (r, 1, 128)
            h = jax.nn.sigmoid(xs * w1 + b1)          # (r, Np, 128)  VPU + EUP
            # Padded hidden sublanes: sigmoid(0)=0.5 * w2s=0 -> contribute 0.
            return jnp.sum(h * w2s, axis=1)           # (r, 128) sublane reduce (XLU)

        if num_full > 0:
            @pl.loop(0, num_full)
            def _(c):
                r0 = pl.multiple_of(c * chunk, chunk)
                o_ref[pl.ds(r0, chunk), :] = rows_out(x_ref[pl.ds(r0, chunk), :])

        if rem > 0:
            r0 = num_full * chunk                     # static offset
            o_ref[pl.ds(r0, rem), :] = rows_out(x_ref[pl.ds(r0, rem), :])

    return kernel


@jax.jit
def nnm_forward(x, params):
    """Forward pass of `nnm`: returns (B, 1) float32, matching the PyTorch module."""
    B = x.shape[0]
    _, npad, _ = params.shape

    rows = pl.cdiv(B, LANES)
    bp = rows * LANES

    x_flat = x.reshape(-1).astype(jnp.float32)
    if bp != B:
        x_flat = jnp.pad(x_flat, (0, bp - B))
    x2d = x_flat.reshape(rows, LANES)                 # lane-major batch view

    # Big blocks to amortize per-grid-step overhead; block equals the full
    # array when small (keeps the (8,128) rule satisfied for any rows).
    block_rows = rows if rows <= MAX_BLOCK_ROWS else MAX_BLOCK_ROWS
    grid = (pl.cdiv(rows, block_rows),)

    cost = pl.CostEstimate(
        flops=4 * bp * npad,               # mul+add (pre), mul (w2), reduce add
        transcendentals=bp * npad,         # one sigmoid per sample per hidden unit
        bytes_accessed=2 * bp * 4 + int(params.size) * 4,
    )

    out2d = pl.pallas_call(
        _make_kernel(block_rows, ROW_CHUNK),
        out_shape=jax.ShapeDtypeStruct((rows, LANES), jnp.float32),
        grid=grid,
        in_specs=[
            pl.BlockSpec((block_rows, LANES), lambda i: (i, 0)),
            pl.BlockSpec((3, npad, LANES), lambda i: (0, 0, 0)),   # resident params
        ],
        out_specs=pl.BlockSpec((block_rows, LANES), lambda i: (i, 0)),
        compiler_params=pltpu.CompilerParams(
            dimension_semantics=("parallel",),
            vmem_limit_bytes=32 * 1024 * 1024,
        ),
        cost_estimate=cost,
    )(x2d, params)

    out = out2d.reshape(-1)
    if bp != B:
        out = out[:B]                      # pure layout plumbing; no-op if B%128==0
    return out.reshape(B, 1)


if __name__ == "__main__":
    N = 32   # module width

    key = jax.random.PRNGKey(0)
    kx, kw1, kb1, kw2, kx2 = jax.random.split(key, 5)

    # PyTorch nn.Linear-style init: uniform(-1/sqrt(fan_in), 1/sqrt(fan_in)).
    bound1 = 1.0 / (DIM ** 0.5)              # hidden_layer: fan_in = DIM = 1
    hidden_w = jax.random.uniform(kw1, (N, DIM), jnp.float32, -bound1, bound1)
    hidden_b = jax.random.uniform(kb1, (N,), jnp.float32, -bound1, bound1)
    bound2 = 1.0 / (N ** 0.5)                # output_layer: fan_in = N, no bias
    out_w = jax.random.uniform(kw2, (1, N), jnp.float32, -bound2, bound2)

    # One-time parameter prep (sublane padding, lane broadcast, 1/width fold).
    params = prepare_params(hidden_w, hidden_b, out_w, width=N)

    def ref_fn(xv):
        return (jax.nn.sigmoid(xv @ hidden_w.T + hidden_b) @ out_w.T) / N

    # Case 1: tiny shipping-size batch (B=8).
    x_small = jax.random.normal(kx, (8, DIM), jnp.float32)
    out_small = jax.block_until_ready(nnm_forward(x_small, params))
    ref_small = ref_fn(x_small)
    assert out_small.shape == (8, 1), out_small.shape
    assert jnp.allclose(out_small, ref_small, atol=1e-5, rtol=1e-5), float(
        jnp.max(jnp.abs(out_small - ref_small))
    )

    # Case 2: batch not a multiple of 128 (exercises padding + inner chunk loop).
    x_big = jax.random.normal(kx2, (5000, DIM), jnp.float32)
    out_big = jax.block_until_ready(nnm_forward(x_big, params))
    ref_big = ref_fn(x_big)
    assert out_big.shape == (5000, 1), out_big.shape
    assert jnp.allclose(out_big, ref_big, atol=1e-5, rtol=1e-5), float(
        jnp.max(jnp.abs(out_big - ref_big))
    )

    print("KERNEL_OK")
</pallas_src>

<mosaic_0001>
module attributes {stable_mosaic.version = 11 : i64} {
  func.func @kernel(%arg0: i32, %arg1: memref<1x128xf32, #tpu.memory_space<vmem>>, %arg2: memref<3x32x128xf32, #tpu.memory_space<vmem>>, %arg3: memref<1x128xf32, #tpu.memory_space<vmem>>) attributes {dimension_semantics = [#tpu.dimension_semantics<parallel>], iteration_bounds = array<i64: 1>, scalar_prefetch = 0 : i64, scratch_operands = 0 : i64, tpu.core_type = #tpu.core_type<tc>, window_params = [{transform_indices = @transform_0, window_bounds = array<i64: 1, 128>}, {pipeline_mode = #tpu.pipeline_mode<synchronous>, transform_indices = @transform_1, window_bounds = array<i64: 3, 32, 128>}, {transform_indices = @transform_2, window_bounds = array<i64: 1, 128>}]} {
    %c0 = arith.constant 0 : index
    %c0_0 = arith.constant 0 : index
    %c0_1 = arith.constant 0 : index
    %0 = vector.load %arg2[%c0, %c0_0, %c0_1] : memref<3x32x128xf32, #tpu.memory_space<vmem>>, vector<3x32x128xf32>
    %1 = vector.extract_strided_slice %0 {offsets = [0, 0, 0], sizes = [1, 32, 128], strides = [1, 1, 1]} : vector<3x32x128xf32> to vector<1x32x128xf32>
    %2 = vector.extract_strided_slice %0 {offsets = [1, 0, 0], sizes = [1, 32, 128], strides = [1, 1, 1]} : vector<3x32x128xf32> to vector<1x32x128xf32>
    %3 = vector.extract_strided_slice %0 {offsets = [2, 0, 0], sizes = [1, 32, 128], strides = [1, 1, 1]} : vector<3x32x128xf32> to vector<1x32x128xf32>
    %c0_2 = arith.constant 0 : index
    %c0_3 = arith.constant 0 : index
    %4 = vector.load %arg1[%c0_2, %c0_3] : memref<1x128xf32, #tpu.memory_space<vmem>>, vector<1x128xf32>
    %5 = vector.shape_cast %4 : vector<1x128xf32> to vector<1x1x128xf32>
    %6 = vector.broadcast %5 : vector<1x1x128xf32> to vector<1x32x128xf32>
    %7 = arith.mulf %6, %1 : vector<1x32x128xf32>
    %8 = arith.addf %7, %2 : vector<1x32x128xf32>
    %9 = arith.negf %8 : vector<1x32x128xf32>
    %10 = math.exp %9 : vector<1x32x128xf32>
    %cst = arith.constant 1.000000e+00 : f32
    %11 = vector.broadcast %cst : f32 to vector<1x32x128xf32>
    %12 = arith.addf %11, %10 : vector<1x32x128xf32>
    %13 = arith.divf %11, %12 : vector<1x32x128xf32>
    %14 = arith.mulf %13, %3 : vector<1x32x128xf32>
    %cst_4 = arith.constant dense<0.000000e+00> : vector<1x128xf32>
    %15 = vector.multi_reduction <add>, %14, %cst_4 [1] : vector<1x32x128xf32> to vector<1x128xf32>
    %c0_5 = arith.constant 0 : index
    %c0_6 = arith.constant 0 : index
    %16 = vector.load %arg3[%c0_5, %c0_6] : memref<1x128xf32, #tpu.memory_space<vmem>>, vector<1x128xf32>
    tpu.vector_store %arg3[%c0_5, %c0_6], %15 {strides = array<i32>} : memref<1x128xf32, #tpu.memory_space<vmem>>, vector<1x128xf32>,
    return
  }
  func.func @transform_0(%arg0: i32) -> (i32, i32) {
    %c0_i32 = arith.constant 0 : i32
    %c0_i32_0 = arith.constant 0 : i32
    return %arg0, %c0_i32 : i32, i32
  }
  func.func @transform_1(%arg0: i32) -> (i32, i32, i32) {
    %c0_i32 = arith.constant 0 : i32
    %c0_i32_0 = arith.constant 0 : i32
    %c0_i32_1 = arith.constant 0 : i32
    %c0_i32_2 = arith.constant 0 : i32
    return %c0_i32, %c0_i32_0, %c0_i32_1 : i32, i32, i32
  }
  func.func @transform_2(%arg0: i32) -> (i32, i32) {
    %c0_i32 = arith.constant 0 : i32
    %c0_i32_0 = arith.constant 0 : i32
    return %arg0, %c0_i32 : i32, i32
  }
}

</mosaic_0001>

<bundles_post_ra>
// kernel: nnm_forward.1
= control target key start
LH: loop header
LB: loop body
LE: loop exit
PB: predicated region body
PF: predicated region fallthrough
CT: control target
= control target key end

     0   :  { %7 = vsyncpa [#allocation3], 0  ;;  %s141_s9 = smov [#allocation2]   ;;  %s168_s0 = inlined_call_operand.vmem [shape: f32[1,128], index: 0, kind: input, shape index: {}]   ;;  %s169_s1 = inlined_call_operand.hbm [shape: f32[3,32,128], index: 1, kind: input, shape index: {}]   ;;  %s170_s2 = inlined_call_operand.vmem [shape: f32[1,128], index: 2, kind: output, shape index: {}]  }
   0x1   :  { %s15_s10 = sshll.u32 %s141_s9, 4  ;;  %s16_s10 = int_to_ptr.vmem [resolvable:$true] %s15_s10 }
   0x2   :  { %s127_s11 = scalar_lea.vmem %s16_s10, 1536  ;;  %p132_p1 = scmp.lt.s32.totalorder %s16_s10, %s16_s10 }
   0x3   :  { %p128_p0 = scmp.ne.s32.totalorder %s16_s10, %s127_s11  ;;  %p133_p2 = scmp.lt.s32.totalorder %s127_s11, %s127_s11 }
   0x5   :  { %p134_p3 = por %p133_p2, %p132_p1 }
   0x7   :  { %p135_p4 = pnand %p134_p3, %p128_p0 }
   0x9   :  { %138 = shalt.err (!%p135_p4)
}
   0xa   :  { %s142_s12 = smov 128   ;;  %s143_s13 = smov 8  }
   0xb   :  { %21 = dma.hbm_to_vmem [thread:$0]  %s169_s1, 1536, %s16_s10, [#allocation3], %s142_s12, %s142_s12, %s143_s13  }
   0xc   :  { %139 = dma.done.wait [#allocation3], 1536  }
   0xd   :  { %140 = vsyncadd [#allocation3], 4294965760  ;;  %v25_v0 = vld [vmem:[#allocation2] sm:$0xff]  ;;  %v26_v1 = vld [vmem:[#allocation2 + $0x8] sm:$0xff] }
   0xe   :  { %v27_v2 = vld [vmem:[#allocation2 + $0x10] sm:$0xff]  ;;  %v28_v3 = vld [vmem:[#allocation2 + $0x18] sm:$0xff]  ;;  %v29_v4 = vld [vmem:[#allocation2 + $0x20] sm:$0xff] }
   0xf   :  { %v30_v5 = vld [vmem:[#allocation2 + $0x28] sm:$0xff]  ;;  %v31_v6 = vld [vmem:[#allocation2 + $0x30] sm:$0xff]  ;;  %v32_v7 = vld [vmem:[#allocation2 + $0x38] sm:$0xff] }
  0x10   :  { %v95_v8 = vld [vmem:[%s168_s0] ss:$0 sm:$0xff]  ;;  %v34_v30 = vld [vmem:[#allocation2 + $0x48] sm:$0xff]  ;;  %v35_v32 = vld [vmem:[#allocation2 + $0x50] sm:$0xff] }
  0x11   :  { %v44_v9 = vmul.f32 %v95_v8, %v25_v0  ;;  %v45_v10 = vmul.f32 %v95_v8, %v26_v1  ;;  %v46_v11 = vmul.f32 %v95_v8, %v27_v2  ;;  %v47_v12 = vmul.f32 %v95_v8, %v28_v3  ;;  %v33_v29 = vld [vmem:[#allocation2 + $0x40] sm:$0xff]  ;;  %v36_v34 = vld [vmem:[#allocation2 + $0x58] sm:$0xff] }
  0x13   :  { %v48_v13 = vadd.f32 %v44_v9, %v29_v4  ;;  %v49_v14 = vadd.f32 %v45_v10, %v30_v5  ;;  %v50_v15 = vadd.f32 %v46_v11, %v31_v6  ;;  %v51_v16 = vadd.f32 %v47_v12, %v32_v7 }
  0x15   :  { %v96_v17 = vmul.f32 -1.442695, %v48_v13  ;;  %v97_v18 = vmul.f32 -1.442695, %v49_v14  ;;  %v98_v19 = vmul.f32 -1.442695, %v50_v15 }
  0x16   :  { %v99_v20 = vmul.f32 -1.442695, %v51_v16 }
  0x17   :  { %103 = vpow2.f32 %v96_v17 }
  0x18   :  { %105 = vpow2.f32 %v97_v18 }
  0x19   :  { %107 = vpow2.f32 %v98_v19 }
  0x1a   :  { %109 = vpow2.f32 %v99_v20 }
  0x24   :  { %v104_v21 = vpop.eup %103 }
  0x25   :  { %v106_v22 = vpop.eup %105  ;;  %v64_v23 = vadd.f32 1.0, %v104_v21 }
  0x26   :  { %v108_v24 = vpop.eup %107  ;;  %v65_v25 = vadd.f32 1.0, %v106_v22 }
  0x27   :  { %v110_v26 = vpop.eup %109  ;;  %v66_v27 = vadd.f32 1.0, %v108_v24  ;;  %111 = vrcp.f32 %v64_v23 }
  0x28   :  { %v67_v28 = vadd.f32 1.0, %v110_v26  ;;  %113 = vrcp.f32 %v65_v25 }
  0x29   :  { %115 = vrcp.f32 %v66_v27 }
  0x2a   :  { %117 = vrcp.f32 %v67_v28 }
  0x34   :  { %v112_v31 = vpop.eup %111 }
  0x35   :  { %v114_v33 = vpop.eup %113  ;;  %v76_v35 = vmul.f32 %v112_v31, %v33_v29 }
  0x36   :  { %v116_v36 = vpop.eup %115  ;;  %v77_v37 = vmul.f32 %v114_v33, %v34_v30 }
  0x37   :  { %v118_v38 = vpop.eup %117  ;;  %v78_v39 = vmul.f32 %v116_v36, %v35_v32 }
  0x38   :  { %v79_v40 = vmul.f32 %v118_v38, %v36_v34  ;;  %v80_v41 = vadd.f32 %v77_v37, %v76_v35 }
  0x3a   :  { %v81_v42 = vadd.f32 %v80_v41, %v78_v39 }
  0x3c   :  { %v82_v43 = vadd.f32 %v81_v42, %v79_v40 }
  0x3e   :  { %v83_v44 = vrot.slane %v82_v43, 4 }
  0x40   :  { %v84_v45 = vadd.f32 %v83_v44, %v82_v43 }
  0x42   :  { %v85_v46 = vrot.slane %v84_v45, 2 }
  0x44   :  { %v86_v47 = vadd.f32 %v85_v46, %v84_v45 }
  0x46   :  { %v87_v48 = vrot.slane %v86_v47, 1 }
  0x48   :  { %v88_v49 = vadd.f32 %v87_v48, %v86_v47 }
  0x4a   :  { %89 = vst [vmem:[%s170_s2] sm:$0x1] %v88_v49 }
  0x4b   :  { %94 = vsyncpa [#allocation3], 1 }

</bundles_post_ra>
